<compile_context>
chip_gen: v6e
topology: v6e:2x2x1
jax: 0.10.0
libtpu: 0.0.40
codegen_flags: <defaults>
</compile_context>

<pallas_src>
import functools

import jax
import jax.numpy as jnp
from jax.experimental import pallas as pl
from jax.experimental.pallas import tpu as pltpu


def _round_up(x: int, m: int) -> int:
    return ((x + m - 1) // m) * m


def prenet_kernel(x_ref, w1_ref, b1_ref, w2_ref, b2_ref, o_ref):
    # Stage 1: Linear(D_in -> H) + ReLU  (Dropout = identity in eval mode).
    # bf16 x bf16 on the MXU, f32 accumulation; bias + ReLU in f32 on the VPU.
    h = jnp.dot(x_ref[...], w1_ref[...], preferred_element_type=jnp.float32)
    h = jnp.maximum(h + b1_ref[...], 0.0)
    # Stage 2: Linear(H -> D_out) + ReLU (Dropout = identity in eval mode).
    y = jnp.dot(h.astype(w2_ref.dtype), w2_ref[...],
                preferred_element_type=jnp.float32)
    y = jnp.maximum(y + b2_ref[...], 0.0)
    o_ref[...] = y.astype(o_ref.dtype)


@functools.partial(jax.jit, static_argnames=("tm", "compute_dtype"))
def prenet_forward(x, w1, b1, w2, b2, *, tm=512, compute_dtype=jnp.bfloat16):
    """x: (B, T, D_in) -> (B, T, D_out). Weights stored as (in, out)."""
    B, T, D_in = x.shape
    H = w1.shape[1]
    D_out = w2.shape[1]
    M = B * T

    # Lane-pad the hidden / output feature dims to multiples of 128 by padding
    # the (small) weights and biases once at trace time. Padded hidden columns
    # see zero W1 columns / zero b1 -> ReLU(0) = 0, and multiply zero W2 rows,
    # so valid outputs are unchanged. Padded output columns are sliced off.
    H_pad = _round_up(H, 128)
    Dout_pad = _round_up(D_out, 128)
    if H_pad != H:
        w1 = jnp.pad(w1, ((0, 0), (0, H_pad - H)))
        b1 = jnp.pad(b1, ((0, 0), (0, H_pad - H)))
        w2 = jnp.pad(w2, ((0, H_pad - H), (0, 0)))
    if Dout_pad != D_out:
        w2 = jnp.pad(w2, ((0, 0), (0, Dout_pad - D_out)))
        b2 = jnp.pad(b2, ((0, 0), (0, Dout_pad - D_out)))

    # bf16 I/O for activations & weights (halves HBM traffic; MXU-native on
    # v5e/v6e/v7x). Biases stay f32; epilogue is f32.
    x2 = x.reshape(M, D_in).astype(compute_dtype)
    w1c = w1.astype(compute_dtype)
    w2c = w2.astype(compute_dtype)
    b1f = b1.astype(jnp.float32)
    b2f = b2.astype(jnp.float32)

    # Row tile: large enough to feed the MXU and amortize per-grid-step
    # overhead, but clamped so small inputs still yield >= 2 grid steps
    # (keeps both v7x TensorCores busy via the "parallel" axis).
    tm_eff = min(tm, max(8, _round_up(pl.cdiv(M, 2), 8)))
    grid = (pl.cdiv(M, tm_eff),)  # ragged last block handled by Pallas masking

    out = pl.pallas_call(
        prenet_kernel,
        out_shape=jax.ShapeDtypeStruct((M, Dout_pad), x.dtype),
        grid=grid,
        in_specs=[
            pl.BlockSpec((tm_eff, D_in), lambda i: (i, 0)),      # activations
            pl.BlockSpec((D_in, H_pad), lambda i: (0, 0)),       # W1 (resident)
            pl.BlockSpec((1, H_pad), lambda i: (0, 0)),          # b1
            pl.BlockSpec((H_pad, Dout_pad), lambda i: (0, 0)),   # W2 (resident)
            pl.BlockSpec((1, Dout_pad), lambda i: (0, 0)),       # b2
        ],
        out_specs=pl.BlockSpec((tm_eff, Dout_pad), lambda i: (i, 0)),
        compiler_params=pltpu.CompilerParams(
            dimension_semantics=("parallel",),
            vmem_limit_bytes=32 * 1024 * 1024,
        ),
    )(x2, w1c, b1f, w2c, b2f)

    if Dout_pad != D_out:
        out = out[:, :D_out]
    return out.reshape(B, T, D_out)


def init_prenet_params(key, input_dim, output_dim, dtype=jnp.float32):
    """Deterministic init mimicking torch.nn.Linear (uniform +/- 1/sqrt(fan_in))."""
    k1, k2, k3, k4 = jax.random.split(key, 4)
    bound1 = 1.0 / (input_dim ** 0.5)
    bound2 = 1.0 / (output_dim ** 0.5)
    # Stored as (in, out) so the kernel does x @ W (equivalent to torch's x @ W.T).
    w1 = jax.random.uniform(k1, (input_dim, output_dim), dtype, -bound1, bound1)
    b1 = jax.random.uniform(k2, (1, output_dim), dtype, -bound1, bound1)
    w2 = jax.random.uniform(k3, (output_dim, output_dim), dtype, -bound2, bound2)
    b2 = jax.random.uniform(k4, (1, output_dim), dtype, -bound2, bound2)
    return w1, b1, w2, b2


if __name__ == "__main__":
    B, T, D_IN, D_OUT = 2, 8, 32, 32
    key = jax.random.PRNGKey(0)
    kx, kp = jax.random.split(key)

    x = jax.random.normal(kx, (B, T, D_IN), dtype=jnp.float32)
    w1, b1, w2, b2 = init_prenet_params(kp, D_IN, D_OUT)

    out = prenet_forward(x, w1, b1, w2, b2)
    out = jax.block_until_ready(out)

    # Pure-JAX reference replicating the kernel's mixed precision
    # (bf16 matmul inputs, f32 accumulation, f32 bias + ReLU epilogue).
    xb = x.reshape(-1, D_IN).astype(jnp.bfloat16)
    w1b = w1.astype(jnp.bfloat16)
    w2b = w2.astype(jnp.bfloat16)
    h_ref = jnp.maximum(
        jnp.dot(xb, w1b, preferred_element_type=jnp.float32) + b1, 0.0)
    ref = jnp.maximum(
        jnp.dot(h_ref.astype(jnp.bfloat16), w2b,
                preferred_element_type=jnp.float32) + b2, 0.0)
    ref = ref.reshape(B, T, D_OUT).astype(x.dtype)

    assert out.shape == (B, T, D_OUT)
    assert jnp.allclose(out, ref, atol=1e-3, rtol=1e-3), (
        float(jnp.max(jnp.abs(out - ref))))

    print("KERNEL_OK")
</pallas_src>

<mosaic_0001>
module attributes {stable_mosaic.version = 11 : i64} {
  func.func @prenet_kernel(%arg0: i32, %arg1: memref<8x32xbf16, #tpu.memory_space<vmem>>, %arg2: memref<32x128xbf16, #tpu.memory_space<vmem>>, %arg3: memref<1x128xf32, #tpu.memory_space<vmem>>, %arg4: memref<128x128xbf16, #tpu.memory_space<vmem>>, %arg5: memref<1x128xf32, #tpu.memory_space<vmem>>, %arg6: memref<8x128xf32, #tpu.memory_space<vmem>>) attributes {dimension_semantics = [#tpu.dimension_semantics<parallel>], iteration_bounds = array<i64: 2>, scalar_prefetch = 0 : i64, scratch_operands = 0 : i64, tpu.core_type = #tpu.core_type<tc>, window_params = [{transform_indices = @transform_0, window_bounds = array<i64: 8, 32>}, {pipeline_mode = #tpu.pipeline_mode<synchronous>, transform_indices = @transform_1, window_bounds = array<i64: 32, 128>}, {pipeline_mode = #tpu.pipeline_mode<synchronous>, transform_indices = @transform_2, window_bounds = array<i64: 1, 128>}, {pipeline_mode = #tpu.pipeline_mode<synchronous>, transform_indices = @transform_3, window_bounds = array<i64: 128, 128>}, {pipeline_mode = #tpu.pipeline_mode<synchronous>, transform_indices = @transform_4, window_bounds = array<i64: 1, 128>}, {transform_indices = @transform_5, window_bounds = array<i64: 8, 128>}]} {
    %c0 = arith.constant 0 : index
    %c0_0 = arith.constant 0 : index
    %0 = vector.load %arg1[%c0, %c0_0] : memref<8x32xbf16, #tpu.memory_space<vmem>>, vector<8x32xbf16>
    %c0_1 = arith.constant 0 : index
    %c0_2 = arith.constant 0 : index
    %1 = vector.load %arg2[%c0_1, %c0_2] : memref<32x128xbf16, #tpu.memory_space<vmem>>, vector<32x128xbf16>
    %cst = arith.constant dense<0.000000e+00> : vector<8x128xf32>
    %2 = tpu.matmul %0, %1, %cst {dimension_numbers = #tpu.dot_dimension_numbers<[1], [0], [0], [1], [0, 0, 1, 1], [], []>} : vector<8x32xbf16>, vector<32x128xbf16>, vector<8x128xf32> -> vector<8x128xf32>
    %c0_3 = arith.constant 0 : index
    %c0_4 = arith.constant 0 : index
    %3 = vector.load %arg3[%c0_3, %c0_4] : memref<1x128xf32, #tpu.memory_space<vmem>>, vector<1x128xf32>
    %4 = vector.broadcast %3 : vector<1x128xf32> to vector<8x128xf32>
    %5 = arith.addf %2, %4 : vector<8x128xf32>
    %cst_5 = arith.constant 0.000000e+00 : f32
    %6 = vector.broadcast %cst_5 : f32 to vector<8x128xf32>
    %7 = arith.maximumf %5, %6 : vector<8x128xf32>
    %8 = arith.truncf %7 : vector<8x128xf32> to vector<8x128xbf16>
    %c0_6 = arith.constant 0 : index
    %c0_7 = arith.constant 0 : index
    %9 = vector.load %arg4[%c0_6, %c0_7] : memref<128x128xbf16, #tpu.memory_space<vmem>>, vector<128x128xbf16>
    %cst_8 = arith.constant dense<0.000000e+00> : vector<8x128xf32>
    %10 = tpu.matmul %8, %9, %cst_8 {dimension_numbers = #tpu.dot_dimension_numbers<[1], [0], [0], [1], [0, 0, 1, 1], [], []>} : vector<8x128xbf16>, vector<128x128xbf16>, vector<8x128xf32> -> vector<8x128xf32>
    %c0_9 = arith.constant 0 : index
    %c0_10 = arith.constant 0 : index
    %11 = vector.load %arg5[%c0_9, %c0_10] : memref<1x128xf32, #tpu.memory_space<vmem>>, vector<1x128xf32>
    %12 = vector.broadcast %11 : vector<1x128xf32> to vector<8x128xf32>
    %13 = arith.addf %10, %12 : vector<8x128xf32>
    %cst_11 = arith.constant 0.000000e+00 : f32
    %14 = vector.broadcast %cst_11 : f32 to vector<8x128xf32>
    %15 = arith.maximumf %13, %14 : vector<8x128xf32>
    %c0_12 = arith.constant 0 : index
    %c0_13 = arith.constant 0 : index
    %16 = vector.load %arg6[%c0_12, %c0_13] : memref<8x128xf32, #tpu.memory_space<vmem>>, vector<8x128xf32>
    tpu.vector_store %arg6[%c0_12, %c0_13], %15 {strides = array<i32>} : memref<8x128xf32, #tpu.memory_space<vmem>>, vector<8x128xf32>,
    return
  }
  func.func @transform_0(%arg0: i32) -> (i32, i32) {
    %c0_i32 = arith.constant 0 : i32
    %c0_i32_0 = arith.constant 0 : i32
    return %arg0, %c0_i32 : i32, i32
  }
  func.func @transform_1(%arg0: i32) -> (i32, i32) {
    %c0_i32 = arith.constant 0 : i32
    %c0_i32_0 = arith.constant 0 : i32
    %c0_i32_1 = arith.constant 0 : i32
    return %c0_i32, %c0_i32_0 : i32, i32
  }
  func.func @transform_2(%arg0: i32) -> (i32, i32) {
    %c0_i32 = arith.constant 0 : i32
    %c0_i32_0 = arith.constant 0 : i32
    %c0_i32_1 = arith.constant 0 : i32
    return %c0_i32, %c0_i32_0 : i32, i32
  }
  func.func @transform_3(%arg0: i32) -> (i32, i32) {
    %c0_i32 = arith.constant 0 : i32
    %c0_i32_0 = arith.constant 0 : i32
    %c0_i32_1 = arith.constant 0 : i32
    return %c0_i32, %c0_i32_0 : i32, i32
  }
  func.func @transform_4(%arg0: i32) -> (i32, i32) {
    %c0_i32 = arith.constant 0 : i32
    %c0_i32_0 = arith.constant 0 : i32
    %c0_i32_1 = arith.constant 0 : i32
    return %c0_i32, %c0_i32_0 : i32, i32
  }
  func.func @transform_5(%arg0: i32) -> (i32, i32) {
    %c0_i32 = arith.constant 0 : i32
    %c0_i32_0 = arith.constant 0 : i32
    return %arg0, %c0_i32 : i32, i32
  }
}

</mosaic_0001>

<bundles_post_ra>
// kernel: prenet_forward.1
= control target key start
LH: loop header
LB: loop body
LE: loop exit
PB: predicated region body
PF: predicated region fallthrough
CT: control target
= control target key end

     0   :  { %s579_s18 = smov 0   ;;  %s636_s0 = inlined_call_operand.vmem [shape: bf16[16,32], index: 0, kind: input, shape index: {}]   ;;  %s637_s1 = inlined_call_operand.vmem [shape: bf16[32,128], index: 1, kind: input, shape index: {}]   ;;  %s638_s2 = inlined_call_operand.vmem [shape: f32[1,128], index: 2, kind: input, shape index: {}]   ;;  %s639_s3 = inlined_call_operand.vmem [shape: bf16[128,128], index: 3, kind: input, shape index: {}]   ;;  %s640_s4 = inlined_call_operand.vmem [shape: f32[1,128], index: 4, kind: input, shape index: {}]   ;;  %s641_s5 = inlined_call_operand.vmem [shape: f32[16,128], index: 5, kind: output, shape index: {}]  }
   0x1 LB: > { %s457_s19 = sadd.s32 4294967295, %s545_s18   ;;  %p461_p0 = scmp.ge.s32.totalorder %s545_s18, 1  ;;  %s545_s18 = sphi %s579_s18, %s15_s18  }
   0x2   : > { %p186_p1 = scmp.lt.s32.totalorder %s545_s18, 3 }
   0x4   : > { %p187_p2 = pnand %p461_p0, %p186_p1 }
   0x5   : > { %p212_p3 = scmp.lt.s32.totalorder (!%p187_p2), %s457_s19, 1 }
   0x6   : > { %190 = sbr.rel (%p187_p2) target bundleno = 418 (0x1a2), region = 40 }
   0xb   : > { %v529_v0 = vld [vmem:[%s637_s1 + $0x8] sm:$0xff]   ;;  %v547_v1 = vmov 0.0   ;;  %v530_v2 = vld [vmem:[%s637_s1] sm:$0xff]   ;;  %vm548_vm0 = vmmov 0   ;;  %v531_v3 = vld [vmem:[%s639_s3 + $0x38] sm:$0xff]   ;;  %s643_s19 = smov (!%p212_p3, %s457_s19), 1 }
   0xc   : > { %491 = vmatprep.subr.bf16.mxu0 %v547_v1  ;;  %499 = vmatprep.subr.bf16.mxu1 %v547_v1  ;;  %v532_v4 = vld [vmem:[%s639_s3 + $0x30] sm:$0xff]   ;;  %s462_s28 = sshll.u32 %s643_s19, 2  ;;  %vm245_vm1 = vcmask 261120   ;;  %v533_v6 = vld [vmem:[%s639_s3 + $0x28] sm:$0xff]   ;;  %v534_v7 = vld [vmem:[%s639_s3 + $0x20] sm:$0xff]   ;;  %s463_s25 = sshll.u32 %s643_s19, 3 }
   0xd   : > { %492 = vmatpush3.bf16.msra.mxu0 %v529_v0  ;;  %495 = vmatprep.mubr.msk.bf16.mxu0 %vm548_vm0, %v547_v1  ;;  %s215_s6 = scalar_lea.vmem %s636_s0, %s462_s28  ;;  %v535_v8 = vld [vmem:[%s639_s3 + $0x18] sm:$0xff]   ;;  %v536_v9 = vld [vmem:[%s639_s3 + $0x10] sm:$0xff]   ;;  %v537_v10 = vld [vmem:[%s639_s3 + $0x8] sm:$0xff]   ;;  %s219_s28 = scalar_lea.vmem %s641_s5, %s463_s25 }
   0xe   : > { %493 = vmatprep.subr.bf16.mxu0 %v547_v1  ;;  %515 = vmatprep.mubr.msk.bf16.mxu1 %vm548_vm0, %v547_v1  ;;  %v221_v5 = vld [vmem:[%s215_s6] sm:$0xf] }
   0xf   : > { %500 = vmatpush3.bf16.msra.mxu1 %v531_v3  ;;  %v538_v11 = vld [vmem:[%s639_s3] sm:$0xff]  }
  0x10   : > { %501 = vmatprep.subr.bf16.mxu1 %v547_v1  ;;  %v464_v12 = vld [vmem:[%s638_s2] ss:$0 sm:$0xff] }
  0x11   : > { %494 = vmatpush3.bf16.msra.mxu0 %v530_v2  ;;  %v468_v20 = vld [vmem:[%s640_s4] ss:$0 sm:$0xff] }
  0x13   : > { %502 = vmatpush3.bf16.msra.mxu1 %v532_v4 }
  0x14   : > { %496 = vmatmul.mubr.msk.bf16.vlgmr.msra.gmra.mxu0 %vm245_vm1, %v221_v5  ;;  %503 = vmatprep.subr.bf16.mxu1 %v547_v1 }
  0x17   : > { %504 = vmatpush3.bf16.msra.mxu1 %v533_v6 }
  0x18   : > { %505 = vmatprep.subr.bf16.mxu1 %v547_v1 }
  0x1b   : > { %506 = vmatpush3.bf16.msra.mxu1 %v534_v7 }
  0x1c   : > { %507 = vmatprep.subr.bf16.mxu1 %v547_v1 }
  0x1f   : > { %508 = vmatpush3.bf16.msra.mxu1 %v535_v8 }
  0x20   : > { %509 = vmatprep.subr.bf16.mxu1 %v547_v1 }
  0x23   : > { %510 = vmatpush3.bf16.msra.mxu1 %v536_v9 }
  0x24   : > { %511 = vmatprep.subr.bf16.mxu1 %v547_v1 }
  0x27   : > { %512 = vmatpush3.bf16.msra.mxu1 %v537_v10 }
  0x28   : > { %513 = vmatprep.subr.bf16.mxu1 %v547_v1 }
  0x2b   : > { %514 = vmatpush3.bf16.msra.mxu1 %v538_v11 }
  0xd4   : > { %v283_v13 = vpop.f32.mrf.mxu0 }
  0xd5   : > { %v284_v14 = vadd.f32 %v464_v12, %v283_v13 }
  0xd6   : > { %v497_v15 = vpop.f32.mrf.mxu0 }
  0xd7   : > { %v289_v16 = vmax.f32 %v284_v14, 0.0 }
  0xd8   : > { %v286_v17 = vpop.f32.mrf.mxu0 }
  0xd9   : > { %v290_v18 = vpack.c.bf16 %v289_v16, %v289_v16 }
  0xda   : > { %v498_v19 = vpop.f32.mrf.mxu0 }
  0xdb   : > { %516 = vmatmul.mubr.bf16.vlgmr.msra.gmra.mxu1 %v290_v18 }
 0x19b   : > { %v396_v21 = vpop.f32.mrf.mxu1 }
 0x19c   : > { %v397_v22 = vadd.f32 %v468_v20, %v396_v21 }
 0x19d   : > { %v517_v23 = vpop.f32.mrf.mxu1 }
 0x19e   : > { %v402_v24 = vmax.f32 %v397_v22, 0.0 }
 0x19f   : > { %v399_v25 = vpop.f32.mrf.mxu1 }
 0x1a0   : > { %403 = vst [vmem:[%s219_s28] sm:$0xff] %v402_v24 }
 0x1a1   : > { %v518_v26 = vpop.f32.mrf.mxu1 }
 0x1a2 PF: > { %s15_s18 = sadd.s32 1, %s545_s18  }
 0x1a3   : > { %p12_p4 = scmp.ge.s32.totalorder %s15_s18, 4  }
 0x1a5   :  { %14 = sbr.rel (!%p12_p4) target bundleno = 1 (0x1), region = 70 }

</bundles_post_ra>
